<compile_context>
chip_gen: v7x
topology: tpu7x:2x2x1
jax: 0.10.0
libtpu: 0.0.40
codegen_flags: <defaults>
</compile_context>

<pallas_src>
import functools

import jax
import jax.numpy as jnp
from jax.experimental import pallas as pl
from jax.experimental.pallas import tpu as pltpu

_LANE = 128
_SUBLANE = 8


def _round_up(x, m):
    return ((x + m - 1) // m) * m


def _mlp_kernel(x_ref, w1_ref, b1_ref, w2_ref, b2_ref, out_ref):
    """Fused: out = relu(x @ W1 + b1) @ W2 + b2  (f32 accumulation)."""
    x = x_ref[...].astype(w1_ref.dtype)
    h = jnp.dot(x, w1_ref[...], preferred_element_type=jnp.float32)
    h = jnp.maximum(h + b1_ref[...].astype(jnp.float32), 0.0)  # bias + ReLU (f32)
    o = jnp.dot(h.astype(w2_ref.dtype), w2_ref[...],
                preferred_element_type=jnp.float32)
    o = o + b2_ref[...].astype(jnp.float32)
    out_ref[...] = o.astype(out_ref.dtype)


def pad_params(w1, b1, w2, b2):
    """One-time (init-time) zero padding of hidden / output widths to a
    multiple of 128 lanes.  Exact: padded hidden units produce relu(0)=0 and
    padded output columns have b2=0; extra columns are sliced off in the
    wrapper.

    w1: (input_dim, num_units)   b1: (num_units,)
    w2: (num_units, out_total)   b2: (out_total,)
    """
    input_dim, num_units = w1.shape
    out_total = w2.shape[1]
    n1p = _round_up(num_units, _LANE)
    n2p = _round_up(out_total, _LANE)
    w1_p = jnp.pad(w1, ((0, 0), (0, n1p - num_units)))
    b1_p = jnp.pad(b1, (0, n1p - num_units)).reshape(1, n1p)
    w2_p = jnp.pad(w2, ((0, n1p - num_units), (0, n2p - out_total)))
    b2_p = jnp.pad(b2, (0, n2p - out_total)).reshape(1, n2p)
    return w1_p, b1_p, w2_p, b2_p


def simple_model_forward(x, w1_p, b1_p, w2_p, b2_p, *, input_dim, output_dim,
                         out_channels, tile_b=512, split_output=True):
    """Eval-mode SimpleModel.forward.

    x:    any shape flattening to (-1, input_dim)
    w1_p: (input_dim, n1_pad)   b1_p: (1, n1_pad)
    w2_p: (n1_pad, n2_pad)      b2_p: (1, n2_pad)       (from pad_params)
    Returns a tuple of `out_channels` arrays (B, output_dim), or the packed
    (B, output_dim*out_channels) slab if split_output=False.
    """
    x2d = x.reshape(-1, input_dim)
    B = x2d.shape[0]
    n1_pad = w1_p.shape[1]
    n2_pad = w2_p.shape[1]
    out_total = output_dim * out_channels

    # Batch tiling: clamp tile to the (sublane-rounded) batch, pad rows so the
    # grid divides evenly.  Padded rows are zeros and sliced off below.
    tile = max(_SUBLANE, min(_round_up(tile_b, _SUBLANE),
                             _round_up(B, _SUBLANE)))
    b_pad = _round_up(B, tile)
    if b_pad != B:
        x2d = jnp.pad(x2d, ((0, b_pad - B), (0, 0)))
    grid = (b_pad // tile,)

    # VMEM budget: double-buffered x/out tiles + resident weights + f32
    # intermediates; generous headroom, capped at v7x's 64 MiB physical VMEM.
    a_it = jnp.dtype(x2d.dtype).itemsize
    w_it = jnp.dtype(w1_p.dtype).itemsize
    est = (2 * tile * input_dim * a_it
           + 2 * tile * n2_pad * a_it
           + 2 * (input_dim * n1_pad + n1_pad + n1_pad * n2_pad + n2_pad) * w_it
           + tile * n1_pad * 4 + tile * n2_pad * 4)
    vmem_limit = int(min(64 * 2**20, max(32 * 2**20, 2 * est)))

    flops = 2 * b_pad * (input_dim * n1_pad + n1_pad * n2_pad)
    bytes_accessed = (b_pad * input_dim * a_it + b_pad * n2_pad * a_it
                      + (input_dim * n1_pad + n1_pad
                         + n1_pad * n2_pad + n2_pad) * w_it)

    out_padded = pl.pallas_call(
        _mlp_kernel,
        out_shape=jax.ShapeDtypeStruct((b_pad, n2_pad), x.dtype),
        grid=grid,
        in_specs=[
            pl.BlockSpec((tile, input_dim), lambda i: (i, 0)),     # x tile
            pl.BlockSpec((input_dim, n1_pad), lambda i: (0, 0)),   # W1 resident
            pl.BlockSpec((1, n1_pad), lambda i: (0, 0)),           # b1 resident
            pl.BlockSpec((n1_pad, n2_pad), lambda i: (0, 0)),      # W2 resident
            pl.BlockSpec((1, n2_pad), lambda i: (0, 0)),           # b2 resident
        ],
        out_specs=pl.BlockSpec((tile, n2_pad), lambda i: (i, 0)),
        compiler_params=pltpu.CompilerParams(
            dimension_semantics=("parallel",),
            vmem_limit_bytes=vmem_limit,
        ),
        cost_estimate=pl.CostEstimate(flops=int(flops), transcendentals=0,
                                      bytes_accessed=int(bytes_accessed)),
    )(x2d, w1_p, b1_p, w2_p, b2_p)

    packed = out_padded[:B, :out_total]
    if not split_output:
        return packed
    # torch.split(output_dim, dim=1) semantics (thin wrapper-side views).
    return tuple(packed[:, i * output_dim:(i + 1) * output_dim]
                 for i in range(out_channels))


def init_params(key, input_dim, num_units, output_dim, out_channels,
                dtype=jnp.float32):
    """Matches SimpleModel._initialize_weights:
    weight ~ Normal(0, 1/(fan_in + 1)), bias = 0.  Returned in (in, out)
    layout (transposed vs PyTorch) so the kernel does x @ W with no
    transpose."""
    k1, k2 = jax.random.split(key)
    w1_t = (jax.random.normal(k1, (num_units, input_dim), jnp.float32)
            * (1.0 / (input_dim + 1))).astype(dtype)
    w2_t = (jax.random.normal(k2, (output_dim * out_channels, num_units),
                              jnp.float32)
            * (1.0 / (num_units + 1))).astype(dtype)
    b1 = jnp.zeros((num_units,), dtype)
    b2 = jnp.zeros((output_dim * out_channels,), dtype)
    return w1_t.T, b1, w2_t.T, b2


def _reference(x, w1, b1, w2, b2, output_dim, out_channels):
    h = jnp.maximum(x.astype(jnp.float32) @ w1.astype(jnp.float32)
                    + b1.astype(jnp.float32), 0.0)
    p = h @ w2.astype(jnp.float32) + b2.astype(jnp.float32)
    return tuple(p[:, i * output_dim:(i + 1) * output_dim]
                 for i in range(out_channels))


if __name__ == "__main__":
    input_dim = 32
    output_dim = 16
    num_units = 64
    out_channels = 2
    batch = 8

    key = jax.random.PRNGKey(0)
    kx, kp, kx2 = jax.random.split(key, 3)

    # ---- f32 path, tiny batch (single grid step) ----
    x = jax.random.normal(kx, (batch, input_dim), jnp.float32)
    w1, b1, w2, b2 = init_params(kp, input_dim, num_units, output_dim,
                                 out_channels, dtype=jnp.float32)
    padded = pad_params(w1, b1, w2, b2)

    fwd = jax.jit(functools.partial(
        simple_model_forward, input_dim=input_dim, output_dim=output_dim,
        out_channels=out_channels, tile_b=512))

    outs = jax.block_until_ready(fwd(x, *padded))
    refs = _reference(x, w1, b1, w2, b2, output_dim, out_channels)
    for o, r in zip(outs, refs):
        assert o.shape == (batch, output_dim)
        assert jnp.allclose(o, r, atol=1e-5, rtol=1e-5)

    # ---- f32 path, bigger batch (multi-step grid + row padding) ----
    big_batch = 300
    xb = jax.random.normal(kx2, (big_batch, input_dim), jnp.float32)
    fwd_tiled = jax.jit(functools.partial(
        simple_model_forward, input_dim=input_dim, output_dim=output_dim,
        out_channels=out_channels, tile_b=128))
    outs_b = jax.block_until_ready(fwd_tiled(xb, *padded))
    refs_b = _reference(xb, w1, b1, w2, b2, output_dim, out_channels)
    for o, r in zip(outs_b, refs_b):
        assert o.shape == (big_batch, output_dim)
        assert jnp.allclose(o, r, atol=1e-5, rtol=1e-5)

    # ---- bf16 weights (native MXU dtype), f32 accumulation ----
    w1h, b1h, w2h, b2h = init_params(kp, input_dim, num_units, output_dim,
                                     out_channels, dtype=jnp.bfloat16)
    padded_h = pad_params(w1h, b1h, w2h, b2h)
    outs_h = jax.block_until_ready(fwd(x, *padded_h))
    refs_h = _reference(x.astype(jnp.bfloat16), w1h, b1h, w2h, b2h,
                        output_dim, out_channels)
    for o, r in zip(outs_h, refs_h):
        assert o.shape == (batch, output_dim)
        assert jnp.allclose(o.astype(jnp.float32), r, atol=2e-2, rtol=2e-2)

    print("KERNEL_OK")
</pallas_src>

<mosaic_0001>
module attributes {stable_mosaic.version = 11 : i64} {
  func.func @_mlp_kernel(%arg0: i32, %arg1: memref<8x32xf32, #tpu.memory_space<vmem>>, %arg2: memref<32x128xf32, #tpu.memory_space<vmem>>, %arg3: memref<1x128xf32, #tpu.memory_space<vmem>>, %arg4: memref<128x128xf32, #tpu.memory_space<vmem>>, %arg5: memref<1x128xf32, #tpu.memory_space<vmem>>, %arg6: memref<8x128xf32, #tpu.memory_space<vmem>>) attributes {dimension_semantics = [#tpu.dimension_semantics<parallel>], iteration_bounds = array<i64: 1>, scalar_prefetch = 0 : i64, scratch_operands = 0 : i64, tpu.core_type = #tpu.core_type<tc>, window_params = [{transform_indices = @transform_0, window_bounds = array<i64: 8, 32>}, {pipeline_mode = #tpu.pipeline_mode<synchronous>, transform_indices = @transform_1, window_bounds = array<i64: 32, 128>}, {pipeline_mode = #tpu.pipeline_mode<synchronous>, transform_indices = @transform_2, window_bounds = array<i64: 1, 128>}, {pipeline_mode = #tpu.pipeline_mode<synchronous>, transform_indices = @transform_3, window_bounds = array<i64: 128, 128>}, {pipeline_mode = #tpu.pipeline_mode<synchronous>, transform_indices = @transform_4, window_bounds = array<i64: 1, 128>}, {transform_indices = @transform_5, window_bounds = array<i64: 8, 128>}]} {
    %c0 = arith.constant 0 : index
    %c0_0 = arith.constant 0 : index
    %0 = vector.load %arg1[%c0, %c0_0] : memref<8x32xf32, #tpu.memory_space<vmem>>, vector<8x32xf32>
    %c0_1 = arith.constant 0 : index
    %c0_2 = arith.constant 0 : index
    %1 = vector.load %arg2[%c0_1, %c0_2] : memref<32x128xf32, #tpu.memory_space<vmem>>, vector<32x128xf32>
    %cst = arith.constant dense<0.000000e+00> : vector<8x128xf32>
    %2 = tpu.matmul %0, %1, %cst {dimension_numbers = #tpu.dot_dimension_numbers<[1], [0], [0], [1], [0, 0, 1, 1], [], []>} : vector<8x32xf32>, vector<32x128xf32>, vector<8x128xf32> -> vector<8x128xf32>
    %c0_3 = arith.constant 0 : index
    %c0_4 = arith.constant 0 : index
    %3 = vector.load %arg3[%c0_3, %c0_4] : memref<1x128xf32, #tpu.memory_space<vmem>>, vector<1x128xf32>
    %4 = vector.broadcast %3 : vector<1x128xf32> to vector<8x128xf32>
    %5 = arith.addf %2, %4 : vector<8x128xf32>
    %cst_5 = arith.constant 0.000000e+00 : f32
    %6 = vector.broadcast %cst_5 : f32 to vector<8x128xf32>
    %7 = arith.maximumf %5, %6 : vector<8x128xf32>
    %c0_6 = arith.constant 0 : index
    %c0_7 = arith.constant 0 : index
    %8 = vector.load %arg4[%c0_6, %c0_7] : memref<128x128xf32, #tpu.memory_space<vmem>>, vector<128x128xf32>
    %cst_8 = arith.constant dense<0.000000e+00> : vector<8x128xf32>
    %9 = tpu.matmul %7, %8, %cst_8 {dimension_numbers = #tpu.dot_dimension_numbers<[1], [0], [0], [1], [0, 0, 1, 1], [], []>} : vector<8x128xf32>, vector<128x128xf32>, vector<8x128xf32> -> vector<8x128xf32>
    %c0_9 = arith.constant 0 : index
    %c0_10 = arith.constant 0 : index
    %10 = vector.load %arg5[%c0_9, %c0_10] : memref<1x128xf32, #tpu.memory_space<vmem>>, vector<1x128xf32>
    %11 = vector.broadcast %10 : vector<1x128xf32> to vector<8x128xf32>
    %12 = arith.addf %9, %11 : vector<8x128xf32>
    %c0_11 = arith.constant 0 : index
    %c0_12 = arith.constant 0 : index
    %13 = vector.load %arg6[%c0_11, %c0_12] : memref<8x128xf32, #tpu.memory_space<vmem>>, vector<8x128xf32>
    tpu.vector_store %arg6[%c0_11, %c0_12], %12 {strides = array<i32>} : memref<8x128xf32, #tpu.memory_space<vmem>>, vector<8x128xf32>,
    return
  }
  func.func @transform_0(%arg0: i32) -> (i32, i32) {
    %c0_i32 = arith.constant 0 : i32
    %c0_i32_0 = arith.constant 0 : i32
    return %arg0, %c0_i32 : i32, i32
  }
  func.func @transform_1(%arg0: i32) -> (i32, i32) {
    %c0_i32 = arith.constant 0 : i32
    %c0_i32_0 = arith.constant 0 : i32
    %c0_i32_1 = arith.constant 0 : i32
    return %c0_i32, %c0_i32_0 : i32, i32
  }
  func.func @transform_2(%arg0: i32) -> (i32, i32) {
    %c0_i32 = arith.constant 0 : i32
    %c0_i32_0 = arith.constant 0 : i32
    %c0_i32_1 = arith.constant 0 : i32
    return %c0_i32, %c0_i32_0 : i32, i32
  }
  func.func @transform_3(%arg0: i32) -> (i32, i32) {
    %c0_i32 = arith.constant 0 : i32
    %c0_i32_0 = arith.constant 0 : i32
    %c0_i32_1 = arith.constant 0 : i32
    return %c0_i32, %c0_i32_0 : i32, i32
  }
  func.func @transform_4(%arg0: i32) -> (i32, i32) {
    %c0_i32 = arith.constant 0 : i32
    %c0_i32_0 = arith.constant 0 : i32
    %c0_i32_1 = arith.constant 0 : i32
    return %c0_i32, %c0_i32_0 : i32, i32
  }
  func.func @transform_5(%arg0: i32) -> (i32, i32) {
    %c0_i32 = arith.constant 0 : i32
    %c0_i32_0 = arith.constant 0 : i32
    return %arg0, %c0_i32 : i32, i32
  }
}

</mosaic_0001>

<bundles_post_ra>
// kernel: simple_model_forward.1
= control target key start
LH: loop header
LB: loop body
LE: loop exit
PB: predicated region body
PF: predicated region fallthrough
CT: control target
= control target key end

     0   :  { %10 = vsyncpa [#allocation3], 0  ;;  %s514_s0 = inlined_call_operand.hbm [shape: f32[8,32], index: 0, kind: input, shape index: {}]   ;;  %s515_s1 = inlined_call_operand.hbm [shape: f32[32,128], index: 1, kind: input, shape index: {}]   ;;  %s516_s2 = inlined_call_operand.vmem [shape: f32[1,128], index: 2, kind: input, shape index: {}]   ;;  %s517_s3 = inlined_call_operand.hbm [shape: f32[128,128], index: 3, kind: input, shape index: {}]   ;;  %s518_s4 = inlined_call_operand.vmem [shape: f32[1,128], index: 4, kind: input, shape index: {}]   ;;  %s519_s5 = inlined_call_operand.vmem [shape: f32[8,128], index: 5, kind: output, shape index: {}]  }
   0x1   :  { %11 = vsyncpa [#allocation5], 0  ;;  %s425_s18 = smov [#allocation4]   ;;  %s355_s22 = scalar_lea.hbm %s515_s1, 512 }
   0x2   :  { %s27_s19 = sshll.u32 %s425_s18, 4  ;;  %p356_p0 = scmp.ne.s32.totalorder %s515_s1, %s355_s22  ;;  %s28_s19 = int_to_ptr.vmem [resolvable:$true] %s27_s19 }
   0x3   :  { %p359_p1 = scmp.lt.u32.totalorder %s355_s22, %s515_s1 }
   0x5   :  { %p361_p2 = pnand %p359_p1, %p356_p0 }
   0x7   :  { %364 = shalt.err (!%p361_p2)
}
   0x8   :  { %s365_s27 = scalar_lea.vmem %s28_s19, 512  ;;  %p370_p4 = scmp.lt.s32.totalorder %s28_s19, %s28_s19 }
   0x9   :  { %p366_p3 = scmp.ne.s32.totalorder %s28_s19, %s365_s27  ;;  %p371_p5 = scmp.lt.s32.totalorder %s365_s27, %s365_s27 }
   0xb   :  { %p372_p6 = por %p371_p5, %p370_p4 }
   0xd   :  { %p373_p7 = pnand %p372_p6, %p366_p3 }
   0xf   :  { %376 = shalt.err (!%p373_p7)
}
  0x10   :  { %s426_s28 = smov 128   ;;  %s427_s29 = smov 8  }
  0x11   :  { %33 = dma.hbm_to_vmem [thread:$0]  %s515_s1, 512, %s28_s19, [#allocation5], %s426_s28, %s426_s28, %s427_s29  }
  0x12   :  { %s428_s7 = smov [#allocation2]   ;;  %s429_s9 = smov [#allocation6]  }
  0x13   :  { %s18_s8 = sshll.u32 %s428_s7, 4  ;;  %s41_s10 = sshll.u32 %s429_s9, 4  ;;  %s19_s8 = int_to_ptr.vmem [resolvable:$true] %s18_s8  ;;  %s42_s10 = int_to_ptr.vmem [resolvable:$true] %s41_s10 }
  0x14   :  { %s377_s13 = scalar_lea.hbm %s514_s0, 128 }
  0x15   :  { %p378_p8 = scmp.ne.s32.totalorder %s514_s0, %s377_s13  ;;  %p381_p9 = scmp.lt.u32.totalorder %s377_s13, %s514_s0 }
  0x17   :  { %p383_p10 = pnand %p381_p9, %p378_p8 }
  0x19   :  { %386 = shalt.err (!%p383_p10)
}
  0x1a   :  { %s387_s1 = scalar_lea.vmem %s19_s8, 128  ;;  %p392_p12 = scmp.lt.s32.totalorder %s19_s8, %s19_s8 }
  0x1b   :  { %p388_p11 = scmp.ne.s32.totalorder %s19_s8, %s387_s1  ;;  %p393_p13 = scmp.lt.s32.totalorder %s387_s1, %s387_s1 }
  0x1d   :  { %p394_p0 = por %p393_p13, %p392_p12 }
  0x1f   :  { %p395_p1 = pnand %p394_p0, %p388_p11 }
  0x21   :  { %398 = shalt.err (!%p395_p1)
}
  0x22   :  { %21 = dma.hbm_to_vmem [thread:$0]  %s514_s0, 128, %s19_s8, [#allocation3]  }
  0x23   :  { %s399_s22 = scalar_lea.hbm %s517_s3, 2048 }
  0x24   :  { %p400_p2 = scmp.ne.s32.totalorder %s517_s3, %s399_s22  ;;  %p403_p3 = scmp.lt.u32.totalorder %s399_s22, %s517_s3 }
  0x26   :  { %p405_p4 = pnand %p403_p3, %p400_p2 }
  0x28   :  { %408 = shalt.err (!%p405_p4)
}
  0x29   :  { %s409_s27 = scalar_lea.vmem %s42_s10, 2048  ;;  %p414_p6 = scmp.lt.s32.totalorder %s42_s10, %s42_s10 }
  0x2a   :  { %p410_p5 = scmp.ne.s32.totalorder %s42_s10, %s409_s27  ;;  %p415_p7 = scmp.lt.s32.totalorder %s409_s27, %s409_s27 }
  0x2c   :  { %p416_p8 = por %p415_p7, %p414_p6 }
  0x2e   :  { %p417_p9 = pnand %p416_p8, %p410_p5 }
  0x30   :  { %420 = shalt.err (!%p417_p9)
}
  0x31   :  { %47 = dma.hbm_to_vmem [thread:$0]  %s517_s3, 2048, %s42_s10, [#allocation5], %s426_s28, %s426_s28, %s427_s29  }
  0x32   :  { %421 = dma.done.wait [#allocation3], 128  }
  0x33   :  { %422 = vsyncadd [#allocation3], 4294967168 }
  0x34   :  { %423 = dma.done.wait [#allocation5], 2560  }
  0x35   :  { %424 = vsyncadd [#allocation5], 4294964736  ;;  %v430_v0 = vmov 0.0|0.0   ;;  %vm431_vm0 = vmmov 0   ;;  %v432_v1 = vmov 0.0   ;;  %v60_v2 = vld [vmem:[#allocation4] sm:$0xff] }
  0x36   :  { %317 = vmatprep.subr.bf16.mxu0 %v430_v0  ;;  %279 = vmatprep.mubr.msk.f32.mxu0 %vm431_vm0, %v432_v1  ;;  %v61_v3 = vld [vmem:[#allocation4 + $0x8] sm:$0xff]  ;;  %v62_v4 = vld [vmem:[#allocation4 + $0x10] sm:$0xff]  ;;  %v63_v6 = vld [vmem:[#allocation4 + $0x18] sm:$0xff]  ;;  %vm71_vm1 = vcmask 261120  }
  0x37   :  { %323 = vmatprep.subr.bf16.mxu1 %v430_v0  ;;  %314 = vmatprep.mubr.msk.f32.mxu1 %vm431_vm0, %v432_v1  ;;  %v318_v5 = vpack.c.bf16 %v61_v3, %v60_v2  ;;  %v146_v7 = vld [vmem:[#allocation6] sm:$0xff]  ;;  %v147_v8 = vld [vmem:[#allocation6 + $0x8] sm:$0xff]  ;;  %v148_v9 = vld [vmem:[#allocation6 + $0x10] sm:$0xff]  ;;  %v321_v11 = vpack.c.bf16 %v63_v6, %v62_v4 }
  0x38   :  { %v149_v10 = vld [vmem:[#allocation6 + $0x18] sm:$0xff]  ;;  %v324_v12 = vpack.c.bf16 %v147_v8, %v146_v7  ;;  %v150_v14 = vld [vmem:[#allocation6 + $0x20] sm:$0xff]  ;;  %v151_v15 = vld [vmem:[#allocation6 + $0x28] sm:$0xff] }
  0x39   :  { %319 = vmatpush3.bf16.msra.mxu0 %v318_v5  ;;  %v327_v13 = vpack.c.bf16 %v149_v10, %v148_v9  ;;  %v59_v16 = vld [vmem:[#allocation2] sm:$0xff]  ;;  %v330_v17 = vpack.c.bf16 %v151_v15, %v150_v14  ;;  %v152_v18 = vld [vmem:[#allocation6 + $0x30] sm:$0xff]  ;;  %v154_v21 = vld [vmem:[#allocation6 + $0x40] sm:$0xff] }
  0x3a   :  { %320 = vmatprep.subr.bf16.mxu0 %v430_v0  ;;  %325 = vmatpush3.bf16.msra.mxu1 %v324_v12  ;;  %v153_v19 = vld [vmem:[#allocation6 + $0x38] sm:$0xff]  ;;  %v155_v22 = vld [vmem:[#allocation6 + $0x48] sm:$0xff]  ;;  %v156_v24 = vld [vmem:[#allocation6 + $0x50] sm:$0xff] }
  0x3b   :  { %326 = vmatprep.subr.bf16.mxu1 %v430_v0  ;;  %v333_v20 = vpack.c.bf16 %v153_v19, %v152_v18  ;;  %v336_v23 = vpack.c.bf16 %v155_v22, %v154_v21  ;;  %v157_v25 = vld [vmem:[#allocation6 + $0x58] sm:$0xff]  ;;  %v158_v27 = vld [vmem:[#allocation6 + $0x60] sm:$0xff]  ;;  %v159_v28 = vld [vmem:[#allocation6 + $0x68] sm:$0xff] }
  0x3c   :  { %v339_v26 = vpack.c.bf16 %v157_v25, %v156_v24  ;;  %v342_v29 = vpack.c.bf16 %v159_v28, %v158_v27  ;;  %v160_v30 = vld [vmem:[#allocation6 + $0x70] sm:$0xff]  ;;  %v161_v31 = vld [vmem:[#allocation6 + $0x78] sm:$0xff] }
  0x3d   :  { %322 = vmatpush3.bf16.msra.mxu0 %v321_v11  ;;  %v345_v32 = vpack.c.bf16 %v161_v31, %v160_v30  ;;  %v246_v33 = vld [vmem:[%s516_s2] ss:$0 sm:$0xff] }
  0x3e   :  { %328 = vmatpush3.bf16.msra.mxu1 %v327_v13  ;;  %v248_v38 = vld [vmem:[%s518_s4] ss:$0 sm:$0xff] }
  0x3f   :  { %329 = vmatprep.subr.bf16.mxu1 %v430_v0 }
  0x40   :  { %280 = vmatmul.mubr.msk.f32.vlgmr.msra.gmra.mrb[0].mxu0 %vm71_vm1, %v59_v16 }
  0x42   :  { %331 = vmatpush3.bf16.msra.mxu1 %v330_v17 }
  0x43   :  { %332 = vmatprep.subr.bf16.mxu1 %v430_v0 }
  0x46   :  { %334 = vmatpush3.bf16.msra.mxu1 %v333_v20 }
  0x47   :  { %335 = vmatprep.subr.bf16.mxu1 %v430_v0 }
  0x4a   :  { %337 = vmatpush3.bf16.msra.mxu1 %v336_v23 }
  0x4b   :  { %338 = vmatprep.subr.bf16.mxu1 %v430_v0 }
  0x4e   :  { %340 = vmatpush3.bf16.msra.mxu1 %v339_v26 }
  0x4f   :  { %341 = vmatprep.subr.bf16.mxu1 %v430_v0 }
  0x52   :  { %343 = vmatpush3.bf16.msra.mxu1 %v342_v29 }
  0x53   :  { %344 = vmatprep.subr.bf16.mxu1 %v430_v0 }
  0x56   :  { %346 = vmatpush3.bf16.msra.mxu1 %v345_v32 }
 0x113   :  { %v141_v34 = vpop.f32.mrb[0].mxu0 }
 0x114   :  { %v142_v35 = vadd.f32 %v246_v33, %v141_v34  ;;  %v281_v36 = vpop.f32.mrb[1].mxu0 }
 0x116   :  { %v145_v37 = vmax.f32 %v142_v35, 0.0 }
 0x118   :  { %315 = vmatmul.mubr.f32.vlgmr.msra.gmra.mrb[0].mxu1 %v145_v37 }
 0x1eb   :  { %v235_v39 = vpop.f32.mrb[0].mxu1 }
 0x1ec   :  { %v236_v40 = vadd.f32 %v248_v38, %v235_v39  ;;  %v316_v41 = vpop.f32.mrb[1].mxu1 }
 0x1ee   :  { %239 = vst [vmem:[%s519_s5] sm:$0xff] %v236_v40 }
 0x1ef   :  { %244 = vsyncpa [#allocation3], 1 }
 0x1f0   :  { %245 = vsyncpa [#allocation5], 1 }

</bundles_post_ra>
